<compile_context>
chip_gen: v7x
topology: tpu7x:2x2x1
jax: 0.10.0
libtpu: 0.0.40
codegen_flags: <defaults>
</compile_context>

<pallas_src>
import math

import jax
import jax.numpy as jnp
from jax.experimental import pallas as pl
from jax.experimental.pallas import tpu as pltpu


def _round_up(x, m):
    return ((x + m - 1) // m) * m


def _fc_kernel(x_ref, w_ref, b_ref, o_ref, acc_ref):
    # x_ref : (tm, tk)     tile of x
    # w_ref : (tk, tn)     tile of fused weight (in_feats, head*out)
    # b_ref : (1,  tn)     tile of fused bias row
    # o_ref : (tm, tn)     output tile
    # acc_ref: (tm, tn)    f32 accumulator (VMEM scratch, lives across k steps)
    k = pl.program_id(2)

    @pl.when(k == 0)
    def _init():
        acc_ref[...] = jnp.zeros_like(acc_ref)

    acc_ref[...] += jnp.dot(
        x_ref[...], w_ref[...], preferred_element_type=jnp.float32
    )

    @pl.when(k == pl.num_programs(2) - 1)
    def _finalize():
        # Bias epilogue: added once, hidden under the final writeback.
        o_ref[...] = (
            acc_ref[...] + b_ref[...].astype(jnp.float32)
        ).astype(o_ref.dtype)


def fc_forward(x, w, bias, *, tm_max=256, tn_max=256, tk_max=512,
               compute_dtype=None):
    """x: (N, in_feats), w: (head, in_feats, out), bias: (head, 1, out).

    Returns (head, N, out) to match torch.matmul(x, w) + bias.
    compute_dtype=jnp.bfloat16 casts x/w for the MXU (f32 accumulate) — useful
    on v6e/v7x when bf16 accuracy is acceptable.
    """
    n, in_feats = x.shape
    head, k_w, out_features = w.shape
    assert k_w == in_feats, (k_w, in_feats)
    fused = head * out_features
    out_dtype = x.dtype

    # Fuse heads into the output-lane dimension: (in_feats, head*out).
    w_fused = jnp.transpose(w, (1, 0, 2)).reshape(in_feats, fused)
    b_fused = bias.reshape(1, fused)

    if compute_dtype is not None:
        x = x.astype(compute_dtype)
        w_fused = w_fused.astype(compute_dtype)

    def pick_tile(dim, max_tile):
        # Small dim -> full-extent block (exempt from the (8,128) rule),
        # large dim -> aligned tile + zero padding.
        if dim <= max_tile:
            return dim, dim
        return max_tile, _round_up(dim, max_tile)

    tm, m_p = pick_tile(n, tm_max)
    tn, f_p = pick_tile(fused, tn_max)
    tk, k_p = pick_tile(in_feats, tk_max)

    x_p = x
    if m_p != n or k_p != in_feats:
        x_p = jnp.pad(x, ((0, m_p - n), (0, k_p - in_feats)))
    w_p = w_fused
    if k_p != in_feats or f_p != fused:
        w_p = jnp.pad(w_fused, ((0, k_p - in_feats), (0, f_p - fused)))
    b_p = b_fused
    if f_p != fused:
        b_p = jnp.pad(b_fused, ((0, 0), (0, f_p - fused)))

    grid = (m_p // tm, f_p // tn, k_p // tk)

    out_p = pl.pallas_call(
        _fc_kernel,
        out_shape=jax.ShapeDtypeStruct((m_p, f_p), out_dtype),
        grid=grid,
        in_specs=[
            pl.BlockSpec((tm, tk), lambda i, j, k: (i, k)),
            pl.BlockSpec((tk, tn), lambda i, j, k: (k, j)),
            pl.BlockSpec((1, tn), lambda i, j, k: (0, j)),
        ],
        out_specs=pl.BlockSpec((tm, tn), lambda i, j, k: (i, j)),
        scratch_shapes=[pltpu.VMEM((tm, tn), jnp.float32)],
        compiler_params=pltpu.CompilerParams(
            dimension_semantics=("parallel", "parallel", "arbitrary"),
        ),
    )(x_p, w_p, b_p)

    out = out_p[:n, :fused]
    # Back to the PyTorch layout: (head, N, out_features).
    return jnp.transpose(out.reshape(n, head, out_features), (1, 0, 2))


def init_params(key, head, in_feats, out_features, dtype=jnp.float32):
    """Deterministic init matching FC.reset_parameters()."""
    kw, kb = jax.random.split(key)
    # xavier_uniform_ with gain=1.414 on a (head, in, out) tensor:
    #   fan_in = in_feats * out_features, fan_out = head * out_features
    gain = 1.414
    fan_in = in_feats * out_features
    fan_out = head * out_features
    bound = gain * math.sqrt(6.0 / (fan_in + fan_out))
    w = jax.random.uniform(
        kw, (head, in_feats, out_features), dtype, minval=-bound, maxval=bound
    )
    stdv = 1.0 / math.sqrt(1.0)
    b = jax.random.uniform(
        kb, (head, 1, out_features), dtype, minval=-stdv, maxval=stdv
    )
    return w, b


def fc_reference(x, w, bias):
    return jnp.einsum("ni,hio->hno", x, w) + bias


if __name__ == "__main__":
    key = jax.random.PRNGKey(0)
    k_x, k_p, k_x2, k_p2 = jax.random.split(key, 4)

    fc = jax.jit(lambda x, w, b: fc_forward(x, w, b))

    # Small shape consistent with the module (single-tile, fully fused path).
    head, in_feats, out_features, n = 4, 32, 32, 8
    x = jax.random.normal(k_x, (n, in_feats), jnp.float32)
    w, b = init_params(k_p, head, in_feats, out_features)

    out = jax.block_until_ready(fc(x, w, b))
    ref = fc_reference(x, w, b)
    assert out.shape == (head, n, out_features), out.shape
    assert jnp.allclose(out, ref, atol=1e-5, rtol=1e-5), "mismatch vs reference"

    # Larger, non-aligned shape to exercise the M/N/K tiling + padding path.
    head2, in2, out2, n2 = 4, 256, 96, 300
    x2 = jax.random.normal(k_x2, (n2, in2), jnp.float32)
    w2, b2 = init_params(k_p2, head2, in2, out2)

    out2_v = jax.block_until_ready(fc(x2, w2, b2))
    ref2 = fc_reference(x2, w2, b2)
    assert out2_v.shape == (head2, n2, out2), out2_v.shape
    assert jnp.allclose(out2_v, ref2, atol=1e-4, rtol=1e-4), "tiled mismatch"

    print("KERNEL_OK")
</pallas_src>

<mosaic_0001>
module attributes {stable_mosaic.version = 11 : i64} {
  func.func @_fc_kernel(%arg0: i32, %arg1: i32, %arg2: i32, %arg3: memref<8x32xf32, #tpu.memory_space<vmem>>, %arg4: memref<32x128xf32, #tpu.memory_space<vmem>>, %arg5: memref<1x128xf32, #tpu.memory_space<vmem>>, %arg6: memref<8x128xf32, #tpu.memory_space<vmem>>, %arg7: memref<8x128xf32, #tpu.memory_space<vmem>>) attributes {dimension_semantics = [#tpu.dimension_semantics<parallel>, #tpu.dimension_semantics<parallel>, #tpu.dimension_semantics<arbitrary>], iteration_bounds = array<i64: 1, 1, 1>, scalar_prefetch = 0 : i64, scratch_operands = 1 : i64, tpu.core_type = #tpu.core_type<tc>, window_params = [{transform_indices = @transform_0, window_bounds = array<i64: 8, 32>}, {transform_indices = @transform_1, window_bounds = array<i64: 32, 128>}, {transform_indices = @transform_2, window_bounds = array<i64: 1, 128>}, {transform_indices = @transform_3, window_bounds = array<i64: 8, 128>}]} {
    %c0_i32 = arith.constant 0 : i32
    %0 = arith.cmpi eq, %arg2, %c0_i32 : i32
    %1 = arith.extui %0 : i1 to i32
    %c0_i32_0 = arith.constant 0 : i32
    %2 = arith.cmpi ne, %1, %c0_i32_0 : i32
    scf.if %2 {
      %cst_10 = arith.constant 0.000000e+00 : f32
      %12 = vector.broadcast %cst_10 : f32 to vector<8x128xf32>
      %c0_11 = arith.constant 0 : index
      %c0_12 = arith.constant 0 : index
      %13 = vector.load %arg7[%c0_11, %c0_12] : memref<8x128xf32, #tpu.memory_space<vmem>>, vector<8x128xf32>
      tpu.vector_store %arg7[%c0_11, %c0_12], %12 {strides = array<i32>} : memref<8x128xf32, #tpu.memory_space<vmem>>, vector<8x128xf32>,
    } else {
    }
    %c0 = arith.constant 0 : index
    %c0_1 = arith.constant 0 : index
    %3 = vector.load %arg7[%c0, %c0_1] : memref<8x128xf32, #tpu.memory_space<vmem>>, vector<8x128xf32>
    %c0_2 = arith.constant 0 : index
    %c0_3 = arith.constant 0 : index
    %4 = vector.load %arg3[%c0_2, %c0_3] : memref<8x32xf32, #tpu.memory_space<vmem>>, vector<8x32xf32>
    %c0_4 = arith.constant 0 : index
    %c0_5 = arith.constant 0 : index
    %5 = vector.load %arg4[%c0_4, %c0_5] : memref<32x128xf32, #tpu.memory_space<vmem>>, vector<32x128xf32>
    %cst = arith.constant dense<0.000000e+00> : vector<8x128xf32>
    %6 = tpu.matmul %4, %5, %cst {dimension_numbers = #tpu.dot_dimension_numbers<[1], [0], [0], [1], [0, 0, 1, 1], [], []>} : vector<8x32xf32>, vector<32x128xf32>, vector<8x128xf32> -> vector<8x128xf32>
    %7 = arith.addf %3, %6 : vector<8x128xf32>
    %c0_6 = arith.constant 0 : index
    %c0_7 = arith.constant 0 : index
    %8 = vector.load %arg7[%c0_6, %c0_7] : memref<8x128xf32, #tpu.memory_space<vmem>>, vector<8x128xf32>
    tpu.vector_store %arg7[%c0_6, %c0_7], %7 {strides = array<i32>} : memref<8x128xf32, #tpu.memory_space<vmem>>, vector<8x128xf32>,
    %c0_i32_8 = arith.constant 0 : i32
    %9 = arith.cmpi eq, %arg2, %c0_i32_8 : i32
    %10 = arith.extui %9 : i1 to i32
    %c0_i32_9 = arith.constant 0 : i32
    %11 = arith.cmpi ne, %10, %c0_i32_9 : i32
    scf.if %11 {
      %c0_10 = arith.constant 0 : index
      %c0_11 = arith.constant 0 : index
      %12 = vector.load %arg7[%c0_10, %c0_11] : memref<8x128xf32, #tpu.memory_space<vmem>>, vector<8x128xf32>
      %c0_12 = arith.constant 0 : index
      %c0_13 = arith.constant 0 : index
      %13 = vector.load %arg5[%c0_12, %c0_13] : memref<1x128xf32, #tpu.memory_space<vmem>>, vector<1x128xf32>
      %14 = vector.broadcast %13 : vector<1x128xf32> to vector<8x128xf32>
      %15 = arith.addf %12, %14 : vector<8x128xf32>
      %c0_14 = arith.constant 0 : index
      %c0_15 = arith.constant 0 : index
      %16 = vector.load %arg6[%c0_14, %c0_15] : memref<8x128xf32, #tpu.memory_space<vmem>>, vector<8x128xf32>
      tpu.vector_store %arg6[%c0_14, %c0_15], %15 {strides = array<i32>} : memref<8x128xf32, #tpu.memory_space<vmem>>, vector<8x128xf32>,
    } else {
    }
    return
  }
  func.func @transform_0(%arg0: i32, %arg1: i32, %arg2: i32) -> (i32, i32) {
    %c0_i32 = arith.constant 0 : i32
    return %arg0, %arg2 : i32, i32
  }
  func.func @transform_1(%arg0: i32, %arg1: i32, %arg2: i32) -> (i32, i32) {
    %c0_i32 = arith.constant 0 : i32
    return %arg2, %arg1 : i32, i32
  }
  func.func @transform_2(%arg0: i32, %arg1: i32, %arg2: i32) -> (i32, i32) {
    %c0_i32 = arith.constant 0 : i32
    %c0_i32_0 = arith.constant 0 : i32
    return %c0_i32, %arg1 : i32, i32
  }
  func.func @transform_3(%arg0: i32, %arg1: i32, %arg2: i32) -> (i32, i32) {
    %c0_i32 = arith.constant 0 : i32
    return %arg0, %arg1 : i32, i32
  }
}

</mosaic_0001>

<bundles_post_ra>
// kernel: _lambda_.1
= control target key start
LH: loop header
LB: loop body
LE: loop exit
PB: predicated region body
PF: predicated region fallthrough
CT: control target
= control target key end

     0   :  { %v145_v0 = vmov 0.0|0.0   ;;  %vm146_vm0 = vmmov 0   ;;  %v147_v4 = vmov 0.0   ;;  %vm25_vm1 = vcmask 261120   ;;  %s189_s1 = inlined_call_operand.vmem [shape: f32[32,128], index: 1, kind: input, shape index: {}]   ;;  %s190_s0 = inlined_call_operand.vmem [shape: f32[8,32], index: 0, kind: input, shape index: {}]   ;;  %s191_s2 = inlined_call_operand.vmem [shape: f32[1,128], index: 2, kind: input, shape index: {}]   ;;  %s192_s3 = inlined_call_operand.vmem [shape: f32[8,128], index: 3, kind: output, shape index: {}]  }
   0x1   :  { %136 = vmatprep.subr.bf16.mxu0 %v145_v0  ;;  %v21_v1 = vld [vmem:[%s189_s1] sm:$0xff]  ;;  %v22_v2 = vld [vmem:[%s189_s1 + $0x8] sm:$0xff]  ;;  %v23_v3 = vld [vmem:[%s189_s1 + $0x10] sm:$0xff]  ;;  %133 = vmatprep.mubr.msk.f32.mxu0 %vm146_vm0, %v147_v4 }
   0x2   :  { %v137_v5 = vpack.c.bf16 %v22_v2, %v21_v1  ;;  %v24_v6 = vld [vmem:[%s189_s1 + $0x18] sm:$0xff]  ;;  %v20_v8 = vld [vmem:[%s190_s0] sm:$0xff] }
   0x3   :  { %v140_v7 = vpack.c.bf16 %v24_v6, %v23_v3  ;;  %v119_v9 = vld [vmem:[%s191_s2] ss:$0 sm:$0xff] }
   0x4   :  { %138 = vmatpush3.bf16.msra.mxu0 %v137_v5 }
   0x5   :  { %139 = vmatprep.subr.bf16.mxu0 %v145_v0 }
   0x8   :  { %141 = vmatpush3.bf16.msra.mxu0 %v140_v7 }
   0xb   :  { %134 = vmatmul.mubr.msk.f32.vlgmr.msra.gmra.mrb[0].mxu0 %vm25_vm1, %v20_v8 }
  0xde   :  { %v95_v10 = vpop.f32.mrb[0].mxu0 }
  0xdf   :  { %v112_v11 = vadd.f32 %v119_v9, %v95_v10  ;;  %v135_v12 = vpop.f32.mrb[1].mxu0 }
  0xe1   :  { %113 = vst [vmem:[%s192_s3] sm:$0xff] %v112_v11 }

</bundles_post_ra>
